<compile_context>
chip_gen: v5e
topology: v5e:2x2
jax: 0.10.0
libtpu: 0.0.40
codegen_flags: <defaults>
</compile_context>

<pallas_src>
import jax
import jax.numpy as jnp
from jax.experimental import pallas as pl
from jax.experimental.pallas import tpu as pltpu

LANES = 128        # lane-dense last dim: one f32 vreg row = 128 lanes
CHUNK_ROWS = 256   # in-kernel chunk size: 7 x (256,128) f32 temps ~= 0.9 MiB live


def _ceil_div(a, b):
    return -(-a // b)


def _round_up(x, m):
    return -(-x // m) * m


def _select_tiling():
    """Generation-dependent (max_row_tile, vmem_limit_bytes)."""
    vmem_bytes = 64 * 1024 * 1024  # conservative default: v7x physical VMEM
    try:
        vmem_bytes = int(pltpu.get_tpu_info().vmem_capacity_bytes)
    except Exception:
        pass
    if vmem_bytes >= 128 * 1024 * 1024:
        # v5e / v6e: 128 MiB VMEM -> 4096-row (2 MiB f32) tiles; 6 inputs x 2
        # pipeline buffers = 24 MiB under a 48 MiB scoped limit.
        return 4096, 48 * 1024 * 1024
    # v7x: 64 MiB VMEM -> cap at 2048 rows (12 MiB of double-buffered f32
    # inputs) with ~28 MiB scoped limit so full double-buffering keeps headroom.
    return 2048, 28 * 1024 * 1024


def _combined_sq(y1, fy1, y2, fy2, n1, n2):
    """Combined squared residuals of the four MSE terms, in f32."""
    f32 = jnp.float32
    y1, fy1, y2, fy2, n1, n2 = (t.astype(f32) for t in (y1, fy1, y2, fy2, n1, n2))
    d1 = y1 - fy1 - y2      # residual for sym_loss1
    d2 = y2 - fy2 - y1      # residual for sym_loss2
    c1 = fy1 - n1           # residual for cons_loss1
    c2 = fy2 - n2           # residual for cons_loss2
    return d1 * d1 + d2 * d2 + c1 * c1 + c2 * c2


def _group_sum_8(sq):
    """Reduce a (chunk, 128) f32 tile to (8, 128) by summing 8-row groups.

    Pure vreg-wise VALU adds on tile-aligned static slices: no XLU collapse,
    no reshape, and the result maps 1:1 onto an (8,128)-conformant out block.
    """
    chunk = sq.shape[0]
    acc = sq[0:8, :]
    for g in range(1, chunk // 8):
        acc = acc + sq[g * 8:(g + 1) * 8, :]
    return acc


def _make_partial_kernel(rows_full, row_tile, chunk, needs_mask):
    """Per-block partial reduction over a (row_tile, 128) slab -> (8, 128)."""
    n_chunks = row_tile // chunk
    assert n_chunks * chunk == row_tile

    def kernel(y1_ref, fy1_ref, y2_ref, fy2_ref, n1_ref, n2_ref, out_ref):
        blk = pl.program_id(0)

        def chunk_partial(c):
            start = c * chunk
            if not isinstance(start, int):
                start = pl.multiple_of(start, chunk)
            sl = pl.ds(start, chunk)
            sq = _combined_sq(y1_ref[sl, :], fy1_ref[sl, :], y2_ref[sl, :],
                              fy2_ref[sl, :], n1_ref[sl, :], n2_ref[sl, :])
            if needs_mask:
                # The last block overhangs the (rows_full, 128) array; its
                # out-of-bounds rows hold unspecified VMEM, so they MUST be
                # zeroed before being summed into the partial.
                row = (blk * row_tile + c * chunk
                       + jax.lax.broadcasted_iota(jnp.int32, sq.shape, 0))
                sq = jnp.where(row < rows_full, sq, 0.0)
            return _group_sum_8(sq)

        if n_chunks == 1:
            out_ref[...] = chunk_partial(0)
        else:
            out_ref[...] = jax.lax.fori_loop(
                0, n_chunks,
                lambda c, acc: acc + chunk_partial(c),
                jnp.zeros((8, LANES), jnp.float32),
                unroll=True)

    return kernel


def noise2noise_loss(y_d1, f_y_d1, y_d2, f_y_d2, noise_d1, noise_d2):
    args = (y_d1, f_y_d1, y_d2, f_y_d2, noise_d1, noise_d2)
    shape = y_d1.shape
    for a in args[1:]:
        assert a.shape == shape, "all inputs must share the same shape"

    n_elems = 1
    for s in shape:
        n_elems *= int(s)

    rows_full = n_elems // LANES
    tail_elems = n_elems - rows_full * LANES

    # Lane-dense layout: flatten NCHW (free bitcast for contiguous inputs).
    # No dtype cast here: bf16 producers stay bf16 in HBM; kernel upcasts.
    flats = [a.reshape(-1) for a in args]

    total = jnp.zeros((), jnp.float32)

    # Rare <128-element lane remainder: summed in plain JAX (negligible work)
    # instead of padding the whole slab (which would add a full extra HBM
    # read+write of every input).
    if tail_elems:
        total = total + jnp.sum(
            _combined_sq(*[f[rows_full * LANES:] for f in flats]),
            dtype=jnp.float32)

    if rows_full > 0:
        max_row_tile, vmem_limit = _select_tiling()
        if rows_full > 8:
            # >= 2 blocks whenever there is more than one vreg-row of work, so
            # the "parallel" grid axis can feed both TensorCores on v7x.
            row_tile = min(max_row_tile, _round_up(_ceil_div(rows_full, 2), 8))
        else:
            row_tile = 8
        if row_tile > CHUNK_ROWS:
            row_tile = min(max_row_tile, _round_up(row_tile, CHUNK_ROWS))
            chunk = CHUNK_ROWS
        else:
            chunk = row_tile
        num_blocks = _ceil_div(rows_full, row_tile)
        needs_mask = (rows_full % row_tile) != 0

        mains = [
            (f if tail_elems == 0 else f[:rows_full * LANES]).reshape(rows_full, LANES)
            for f in flats
        ]
        itemsize = jnp.dtype(y_d1.dtype).itemsize

        kernel = _make_partial_kernel(rows_full, row_tile, chunk, needs_mask)
        in_spec = pl.BlockSpec((row_tile, LANES), lambda i: (i, 0))
        partials = pl.pallas_call(
            kernel,
            out_shape=jax.ShapeDtypeStruct((num_blocks * 8, LANES), jnp.float32),
            grid_spec=pltpu.PrefetchScalarGridSpec(
                num_scalar_prefetch=0,
                grid=(num_blocks,),
                in_specs=[in_spec] * 6,
                out_specs=pl.BlockSpec((8, LANES), lambda i: (i, 0)),
            ),
            compiler_params=pltpu.CompilerParams(
                # Each step writes its own (8,128) partial -> truly parallel,
                # so v7x shards the grid across both TensorCores.
                dimension_semantics=("parallel",),
                vmem_limit_bytes=vmem_limit,
            ),
            cost_estimate=pl.CostEstimate(
                flops=17 * rows_full * LANES,
                transcendentals=0,
                bytes_accessed=6 * rows_full * LANES * itemsize
                               + num_blocks * 8 * LANES * 4,
            ),
        )(*mains)
        total = total + jnp.sum(partials, dtype=jnp.float32)

    # All four MSE terms share the same element count N, so
    # 0.5*(m1 + m2) + 0.5*(m3 + m4) == (0.5 / N) * total_sum_of_squares.
    # (If per-term masking / different counts are ever introduced, this
    # folding is no longer valid.)
    return total * jnp.float32(0.5 / n_elems)


def _reference_loss(y_d1, f_y_d1, y_d2, f_y_d2, noise_d1, noise_d2):
    mse = lambda a, b: jnp.mean((a - b) ** 2)
    sym1 = mse(y_d1 - f_y_d1, y_d2)
    sym2 = mse(y_d2 - f_y_d2, y_d1)
    cons1 = mse(f_y_d1, noise_d1)
    cons2 = mse(f_y_d2, noise_d2)
    return 0.5 * (sym1 + sym2) + 0.5 * (cons1 + cons2)


if __name__ == "__main__":
    key = jax.random.PRNGKey(0)
    # 2*3*33*33 = 6534 elements: 51 full lane-rows (row_tile=32 -> 2 blocks,
    # last block has 19 valid rows -> exercises the in-kernel row mask) plus a
    # 6-element lane tail (exercises the plain-JAX tail path).
    B, C, H, W = 2, 3, 33, 33
    keys = jax.random.split(key, 6)
    y_d1, f_y_d1, y_d2, f_y_d2, noise_d1, noise_d2 = (
        jax.random.normal(k, (B, C, H, W), jnp.float32) for k in keys)

    loss = noise2noise_loss(y_d1, f_y_d1, y_d2, f_y_d2, noise_d1, noise_d2)
    loss = jax.block_until_ready(loss)

    ref = _reference_loss(y_d1, f_y_d1, y_d2, f_y_d2, noise_d1, noise_d2)
    assert jnp.allclose(loss, ref, rtol=1e-4, atol=1e-5), (loss, ref)

    print("KERNEL_OK")
</pallas_src>

<mosaic_0001>
module attributes {stable_mosaic.version = 11 : i64} {
  func.func @kernel(%arg0: i32, %arg1: memref<32x128xf32, #tpu.memory_space<vmem>>, %arg2: memref<32x128xf32, #tpu.memory_space<vmem>>, %arg3: memref<32x128xf32, #tpu.memory_space<vmem>>, %arg4: memref<32x128xf32, #tpu.memory_space<vmem>>, %arg5: memref<32x128xf32, #tpu.memory_space<vmem>>, %arg6: memref<32x128xf32, #tpu.memory_space<vmem>>, %arg7: memref<8x128xf32, #tpu.memory_space<vmem>>) attributes {dimension_semantics = [#tpu.dimension_semantics<parallel>], iteration_bounds = array<i64: 2>, scalar_prefetch = 0 : i64, scratch_operands = 0 : i64, tpu.core_type = #tpu.core_type<tc>, window_params = [{transform_indices = @transform_0, window_bounds = array<i64: 32, 128>}, {transform_indices = @transform_1, window_bounds = array<i64: 32, 128>}, {transform_indices = @transform_2, window_bounds = array<i64: 32, 128>}, {transform_indices = @transform_3, window_bounds = array<i64: 32, 128>}, {transform_indices = @transform_4, window_bounds = array<i64: 32, 128>}, {transform_indices = @transform_5, window_bounds = array<i64: 32, 128>}, {transform_indices = @transform_6, window_bounds = array<i64: 8, 128>}]} {
    %c0 = arith.constant 0 : index
    %c0_0 = arith.constant 0 : index
    %0 = vector.load %arg1[%c0, %c0_0] : memref<32x128xf32, #tpu.memory_space<vmem>>, vector<32x128xf32>
    %c0_1 = arith.constant 0 : index
    %c0_2 = arith.constant 0 : index
    %1 = vector.load %arg2[%c0_1, %c0_2] : memref<32x128xf32, #tpu.memory_space<vmem>>, vector<32x128xf32>
    %c0_3 = arith.constant 0 : index
    %c0_4 = arith.constant 0 : index
    %2 = vector.load %arg3[%c0_3, %c0_4] : memref<32x128xf32, #tpu.memory_space<vmem>>, vector<32x128xf32>
    %c0_5 = arith.constant 0 : index
    %c0_6 = arith.constant 0 : index
    %3 = vector.load %arg4[%c0_5, %c0_6] : memref<32x128xf32, #tpu.memory_space<vmem>>, vector<32x128xf32>
    %c0_7 = arith.constant 0 : index
    %c0_8 = arith.constant 0 : index
    %4 = vector.load %arg5[%c0_7, %c0_8] : memref<32x128xf32, #tpu.memory_space<vmem>>, vector<32x128xf32>
    %c0_9 = arith.constant 0 : index
    %c0_10 = arith.constant 0 : index
    %5 = vector.load %arg6[%c0_9, %c0_10] : memref<32x128xf32, #tpu.memory_space<vmem>>, vector<32x128xf32>
    %6 = arith.subf %0, %1 : vector<32x128xf32>
    %7 = arith.subf %6, %2 : vector<32x128xf32>
    %8 = arith.subf %2, %3 : vector<32x128xf32>
    %9 = arith.subf %8, %0 : vector<32x128xf32>
    %10 = arith.subf %1, %4 : vector<32x128xf32>
    %11 = arith.subf %3, %5 : vector<32x128xf32>
    %12 = arith.mulf %7, %7 : vector<32x128xf32>
    %13 = arith.mulf %9, %9 : vector<32x128xf32>
    %14 = arith.addf %12, %13 : vector<32x128xf32>
    %15 = arith.mulf %10, %10 : vector<32x128xf32>
    %16 = arith.addf %14, %15 : vector<32x128xf32>
    %17 = arith.mulf %11, %11 : vector<32x128xf32>
    %18 = arith.addf %16, %17 : vector<32x128xf32>
    %c32_i32 = arith.constant 32 : i32
    %19 = arith.muli %arg0, %c32_i32 : i32
    %c0_i32 = arith.constant 0 : i32
    %20 = arith.addi %19, %c0_i32 : i32
    %21 = tpu.iota {dimensions = array<i32: 0>} : vector<32x128xi32>
    %22 = vector.broadcast %20 : i32 to vector<32x128xi32>
    %23 = arith.addi %22, %21 : vector<32x128xi32>
    %c51_i32 = arith.constant 51 : i32
    %24 = vector.broadcast %c51_i32 : i32 to vector<32x128xi32>
    %25 = arith.cmpi slt, %23, %24 : vector<32x128xi32>
    %cst = arith.constant 0.000000e+00 : f32
    %26 = vector.broadcast %cst : f32 to vector<32x128xf32>
    %27 = arith.select %25, %18, %26 : vector<32x128xi1>, vector<32x128xf32>
    %28 = vector.extract_strided_slice %27 {offsets = [0, 0], sizes = [8, 128], strides = [1, 1]} : vector<32x128xf32> to vector<8x128xf32>
    %29 = vector.extract_strided_slice %27 {offsets = [8, 0], sizes = [8, 128], strides = [1, 1]} : vector<32x128xf32> to vector<8x128xf32>
    %30 = arith.addf %28, %29 : vector<8x128xf32>
    %31 = vector.extract_strided_slice %27 {offsets = [16, 0], sizes = [8, 128], strides = [1, 1]} : vector<32x128xf32> to vector<8x128xf32>
    %32 = arith.addf %30, %31 : vector<8x128xf32>
    %33 = vector.extract_strided_slice %27 {offsets = [24, 0], sizes = [8, 128], strides = [1, 1]} : vector<32x128xf32> to vector<8x128xf32>
    %34 = arith.addf %32, %33 : vector<8x128xf32>
    %c0_11 = arith.constant 0 : index
    %c0_12 = arith.constant 0 : index
    %35 = vector.load %arg7[%c0_11, %c0_12] : memref<8x128xf32, #tpu.memory_space<vmem>>, vector<8x128xf32>
    tpu.vector_store %arg7[%c0_11, %c0_12], %34 {strides = array<i32>} : memref<8x128xf32, #tpu.memory_space<vmem>>, vector<8x128xf32>,
    return
  }
  func.func @transform_0(%arg0: i32) -> (i32, i32) {
    %c0_i32 = arith.constant 0 : i32
    %c0_i32_0 = arith.constant 0 : i32
    return %arg0, %c0_i32 : i32, i32
  }
  func.func @transform_1(%arg0: i32) -> (i32, i32) {
    %c0_i32 = arith.constant 0 : i32
    %c0_i32_0 = arith.constant 0 : i32
    return %arg0, %c0_i32 : i32, i32
  }
  func.func @transform_2(%arg0: i32) -> (i32, i32) {
    %c0_i32 = arith.constant 0 : i32
    %c0_i32_0 = arith.constant 0 : i32
    return %arg0, %c0_i32 : i32, i32
  }
  func.func @transform_3(%arg0: i32) -> (i32, i32) {
    %c0_i32 = arith.constant 0 : i32
    %c0_i32_0 = arith.constant 0 : i32
    return %arg0, %c0_i32 : i32, i32
  }
  func.func @transform_4(%arg0: i32) -> (i32, i32) {
    %c0_i32 = arith.constant 0 : i32
    %c0_i32_0 = arith.constant 0 : i32
    return %arg0, %c0_i32 : i32, i32
  }
  func.func @transform_5(%arg0: i32) -> (i32, i32) {
    %c0_i32 = arith.constant 0 : i32
    %c0_i32_0 = arith.constant 0 : i32
    return %arg0, %c0_i32 : i32, i32
  }
  func.func @transform_6(%arg0: i32) -> (i32, i32) {
    %c0_i32 = arith.constant 0 : i32
    %c0_i32_0 = arith.constant 0 : i32
    return %arg0, %c0_i32 : i32, i32
  }
}

</mosaic_0001>

<bundles_post_ra>
// kernel: tpu_custom_call.1
= control target key start
LH: loop header
LB: loop body
LE: loop exit
PB: predicated region body
PF: predicated region fallthrough
CT: control target
= control target key end

     0   :  { %11 = vsyncpa [#allocation3], 0  ;;  %s1765_s0 = inlined_call_operand.hbm [shape: f32[51,128], index: 0, kind: input, shape index: {}]   ;;  %s1766_s1 = inlined_call_operand.hbm [shape: f32[51,128], index: 1, kind: input, shape index: {}]   ;;  %s1767_s2 = inlined_call_operand.hbm [shape: f32[51,128], index: 2, kind: input, shape index: {}]   ;;  %s1768_s3 = inlined_call_operand.hbm [shape: f32[51,128], index: 3, kind: input, shape index: {}]   ;;  %s1769_s4 = inlined_call_operand.hbm [shape: f32[51,128], index: 4, kind: input, shape index: {}]   ;;  %s1770_s5 = inlined_call_operand.hbm [shape: f32[51,128], index: 5, kind: input, shape index: {}]   ;;  %s1771_s6 = inlined_call_operand.hbm [shape: f32[16,128], index: 6, kind: output, shape index: {}]  }
   0x1   :  { %13 = vsyncpa [#allocation3 + $0x1], 0 }
   0x2   :  { %14 = vsyncpa [#allocation6], 0 }
   0x3   :  { %16 = vsyncpa [#allocation6 + $0x1], 0 }
   0x4   :  { %17 = vsyncpa [#allocation9], 0 }
   0x5   :  { %19 = vsyncpa [#allocation9 + $0x1], 0 }
   0x6   :  { %20 = vsyncpa [#allocation12], 0 }
   0x7   :  { %22 = vsyncpa [#allocation12 + $0x1], 0 }
   0x8   :  { %23 = vsyncpa [#allocation4], 0 }
   0x9   :  { %25 = vsyncpa [#allocation4 + $0x1], 0  ;;  %s1330_s21 = smov 0   ;;  %s1332_s22 = smov 0  }
   0xa   :  { %s1334_s23 = smov 0   ;;  %s1336_s24 = smov 0  }
   0xb LB: > { %s1351_s25 = sadd.s32 4294967295, %s1275_s24   ;;  %s842_s26 = sadd.s32 4294967294, %s1275_s24   ;;  %s1275_s24 = sphi %s1336_s24, %s1799_s24   ;;  %s1271_s23 = sphi %s1334_s23, %s1803_s23   ;;  %s1267_s22 = sphi %s1332_s22, %s1802_s22   ;;  %s1263_s21 = sphi %s1330_s21, %s1801_s21  }
   0xc   : > { %s1355_s27 = sadd.s32 1, %s1275_s24   ;;  %s38_s28 = sadd.s32 1, %s1271_s23 }
   0xd   : > { %1780 = sst [smem:[#allocation19_spill]] %s1355_s27  ;;  %s35_s29 = ssub.s32 %s1275_s24, %s1355_s27 }
   0xe   : > { %p45_p0 = scmp.ne.s32.totalorder %s1271_s23, %s1267_s22  ;;  %p36_p1 = scmp.eq.s32.totalorder %s35_s29, 0 }
   0xf   : > { %p46_p2 = scmp.eq.s32.totalorder %s1275_s24, 0  ;;  %p51_p3 = scmp.ne.s32.totalorder %s1267_s22, %s1263_s21 }
  0x10   : > { %p52_p4 = scmp.eq.s32.totalorder %s1351_s25, 0  ;;  %p205_p7 = scmp.eq.s32.totalorder %s1351_s25, 1 }
  0x11   : > { %s1367_s30 = scalar_select %p36_p1, %s1271_s23, %s38_s28  }
  0x12   : > { %p1369_p5 = por %p46_p2, %p45_p0  ;;  %p1373_p6 = por %p52_p4, %p51_p3 }
  0x13   : > { %1781 = sst [smem:[#allocation20_spill]] %s1367_s30  ;;  %p211_p8 = scmp.eq.s32.totalorder %s842_s26, 1 }
  0x14   : > { %p1378_p9 = por %p205_p7, %p45_p0  ;;  %p1775_p11 = scmp.ge.s32.totalorder %s1275_s24, 2 }
  0x15   : > { %p1382_p10 = por %p211_p8, %p51_p3 }
  0x16   : > { %227 = sbr.rel (%p1775_p11) target bundleno = 248 (0xf8), region = 16 }
  0x17   : > { %s1785_s10 = scalar_select %p1382_p10, 1, 0 }
  0x1b   : > { %230 = sbr.rel (!%p1369_p5) target bundleno = 64 (0x40), region = 20  ;;  %s231_s11 = sand.u32 (%p1369_p5), 1, %s1271_s23  }
  0x1c   : > { %s846_s12 = sshll.u32 (%p1369_p5), %s1275_s24, 2  ;;  %s845_s13 = sshll.u32 (%p1369_p5), %s231_s11, 5 }
  0x1d   : > { %s237_s14 = ssub.s32 (%p1369_p5), 7, %s846_s12  ;;  %s1396_s18 = scalar_lea.sflag (%p1369_p5), [#allocation3], %s231_s11 }
  0x1e   : > { %p238_p12 = scmp.lt.s32.totalorder (%p1369_p5), %s237_s14, 4  ;;  %s235_s19 = scalar_lea.vmem (%p1369_p5), [#allocation2], %s845_s13 }
  0x20   : > { %s1805_s14 = smov (!%p238_p12, %s237_s14), 4 }
  0x21   : > { %s847_s15 = sshll.u32 %s1805_s14, 3 }
  0x22   : > { %s241_s16 = ssub.s32 32, %s847_s15 }
  0x23   : > { %s242_s17 = sshll.u32 %s241_s16, 4 }
  0x24   : > { %243 = vsyncadd %s1396_s18, %s242_s17  ;;  %p1399_p13 = scmp.ne.s32.totalorder %s847_s15, 0  ;;  %s900_s26 = sshll.u32 %s1275_s24, 5 }
  0x25   : > { %s246_s12 = scalar_lea.hbm %s1765_s0, %s900_s26  ;;  %s1407_s30 = sshll.u32 %s235_s19, 4  ;;  %s251_s30 = int_to_ptr.vmem [resolvable:$true] %s1407_s30 }
  0x26   : > { %s248_s11 = sshll.u32 %s246_s12, 4  ;;  %s1772_s13 = sshll.u32 %s1805_s14, 7  ;;  %s1410_s11 = int_to_ptr.hbm [resolvable:$true] %s248_s11 }
  0x27   : > { %s963_s16 = sshra.s32 %s1410_s11, 4  ;;  %s965_s15 = sshrl.u32 %s1772_s13, 4  ;;  %s964_s16 = int_to_ptr.hbm [resolvable:$true] %s963_s16 }
  0x28   : > { %s970_s17 = scalar_lea.hbm %s964_s16, %s965_s15  ;;  %s974_s19 = scalar_lea.hbm %s1765_s0, 56 }
  0x29   : > { %p971_p0 = scmp.ne.s32.totalorder %s964_s16, %s970_s17  ;;  %p975_p3 = scmp.lt.s32.totalorder %s964_s16, %s1765_s0 }
  0x2a   : > { %p976_p4 = scmp.lt.s32.totalorder %s974_s19, %s970_s17 }
  0x2b   : > { %p972_p1 = pnand %p971_p0, %p1399_p13 }
  0x2c   : > { %p977_p7 = por %p976_p4, %p975_p3 }
  0x2d   : > { %p973_p2 = pneg %p972_p1 }
  0x2f   : > { %p978_p8 = pnand %p977_p7, %p973_p2 }
  0x31   : > { %981 = shalt.err (!%p978_p8)
}
  0x32   : > { %s982_s13 = sshra.s32 %s251_s30, 4  ;;  %s1277_s28 = smov [#allocation2]   ;;  %s983_s13 = int_to_ptr.vmem [resolvable:$true] %s982_s13 }
  0x33   : > { %s989_s27 = scalar_lea.vmem %s983_s13, %s965_s15  ;;  %s993_s26 = scalar_lea.vmem %s1277_s28, 64 }
  0x34   : > { %p990_p12 = scmp.ne.s32.totalorder %s983_s13, %s989_s27  ;;  %p995_p11 = scmp.lt.s32.totalorder %s993_s26, %s989_s27 }
  0x36   : > { %p991_p0 = pnand %p990_p12, %p1399_p13 }
  0x38   : > { %p992_p1 = pneg %p991_p0 }
  0x3a   : > { %p997_p10 = pnand %p995_p11, %p992_p1 }
  0x3c   : > { %1000 = shalt.err (!%p997_p10)
}
  0x3d   : > { %s1278_s16 = smov 128   ;;  %s1279_s17 = smov 8  }
  0x3e   : > { %s1787_s19 = sshll.u32 %s1805_s14, 7 }
  0x3f   : > { %256 = dma.hbm_to_vmem [thread:$0]  (%p1399_p13), %s1410_s11, %s1787_s19, %s251_s30, %s1396_s18, %s1278_s16, %s1278_s16, %s1279_s17  }
  0x40 PF: > { %259 = sbr.rel (!%p1369_p5) target bundleno = 101 (0x65), region = 24  ;;  %s260_s27 = sand.u32 (%p1369_p5), 1, %s1275_s24  }
  0x41   : > { %s262_s13 = sand.u32 (%p1369_p5), 1, %s1271_s23   ;;  %s853_s29 = sshll.u32 (%p1369_p5), %s1275_s24, 2 }
  0x42   : > { %s852_s15 = sshll.u32 (%p1369_p5), %s262_s13, 5  ;;  %s266_s12 = ssub.s32 (%p1369_p5), 7, %s853_s29 }
  0x43   : > { %p267_p10 = scmp.lt.s32.totalorder (%p1369_p5), %s266_s12, 4  ;;  %s1444_s30 = scalar_lea.sflag (%p1369_p5), [#allocation6], %s260_s27 }
  0x44   : > { %s264_s18 = scalar_lea.vmem (%p1369_p5), [#allocation5], %s852_s15 }
  0x45   : > { %s1807_s12 = smov (!%p267_p10, %s266_s12), 4 }
  0x46   : > { %s854_s20 = sshll.u32 %s1807_s12, 3 }
  0x47   : > { %s270_s28 = ssub.s32 32, %s854_s20 }
  0x48   : > { %s271_s14 = sshll.u32 %s270_s28, 4 }
  0x49   : > { %272 = vsyncadd %s1444_s30, %s271_s14  ;;  %p1447_p11 = scmp.ne.s32.totalorder %s854_s20, 0  ;;  %s901_s26 = sshll.u32 %s1275_s24, 5 }
  0x4a   : > { %s275_s19 = scalar_lea.hbm %s1766_s1, %s901_s26  ;;  %s1455_s13 = sshll.u32 %s264_s18, 4  ;;  %s280_s13 = int_to_ptr.vmem [resolvable:$true] %s1455_s13 }
  0x4b   : > { %s277_s27 = sshll.u32 %s275_s19, 4  ;;  %s1776_s15 = sshll.u32 %s1807_s12, 7  ;;  %s1458_s27 = int_to_ptr.hbm [resolvable:$true] %s277_s27 }
  0x4c   : > { %s1002_s29 = sshra.s32 %s1458_s27, 4  ;;  %s1004_s20 = sshrl.u32 %s1776_s15, 4  ;;  %s1003_s29 = int_to_ptr.hbm [resolvable:$true] %s1002_s29 }
  0x4d   : > { %s1009_s28 = scalar_lea.hbm %s1003_s29, %s1004_s20  ;;  %s1013_s18 = scalar_lea.hbm %s1766_s1, 56 }
  0x4e   : > { %p1010_p13 = scmp.ne.s32.totalorder %s1003_s29, %s1009_s28  ;;  %p1014_p4 = scmp.lt.s32.totalorder %s1003_s29, %s1766_s1 }
  0x4f   : > { %p1015_p7 = scmp.lt.s32.totalorder %s1013_s18, %s1009_s28 }
  0x50   : > { %p1011_p2 = pnand %p1010_p13, %p1447_p11 }
  0x51   : > { %p1016_p8 = por %p1015_p7, %p1014_p4 }
  0x52   : > { %p1012_p3 = pneg %p1011_p2 }
  0x54   : > { %p1017_p12 = pnand %p1016_p8, %p1012_p3 }
  0x56   : > { %1020 = shalt.err (!%p1017_p12)
}
  0x57   : > { %s1021_s19 = sshra.s32 %s280_s13, 4  ;;  %s1280_s14 = smov [#allocation5]   ;;  %s1022_s19 = int_to_ptr.vmem [resolvable:$true] %s1021_s19 }
  0x58   : > { %s1028_s15 = scalar_lea.vmem %s1022_s19, %s1004_s20  ;;  %s1032_s26 = scalar_lea.vmem %s1280_s14, 64 }
  0x59   : > { %p1029_p0 = scmp.ne.s32.totalorder %s1022_s19, %s1028_s15  ;;  %p1034_p13 = scmp.lt.s32.totalorder %s1032_s26, %s1028_s15 }
  0x5b   : > { %p1030_p1 = pnand %p1029_p0, %p1447_p11 }
  0x5d   : > { %p1031_p10 = pneg %p1030_p1 }
  0x5f   : > { %p1036_p2 = pnand %p1034_p13, %p1031_p10 }
  0x61   : > { %1039 = shalt.err (!%p1036_p2)
}
  0x62   : > { %s1281_s29 = smov 128   ;;  %s1282_s28 = smov 8  }
  0x63   : > { %s1789_s18 = sshll.u32 %s1807_s12, 7 }
  0x64   : > { %285 = dma.hbm_to_vmem [thread:$0]  (%p1447_p11), %s1458_s27, %s1789_s18, %s280_s13, %s1444_s30, %s1281_s29, %s1281_s29, %s1282_s28  }
  0x65 PF: > { %288 = sbr.rel (!%p1369_p5) target bundleno = 138 (0x8a), region = 28  ;;  %s289_s15 = sand.u32 (%p1369_p5), 1, %s1275_s24  }
  0x66   : > { %s291_s20 = sand.u32 (%p1369_p5), 1, %s1271_s23   ;;  %s860_s17 = sshll.u32 (%p1369_p5), %s1275_s24, 2 }
  0x67   : > { %s859_s16 = sshll.u32 (%p1369_p5), %s291_s20, 5  ;;  %s295_s19 = ssub.s32 (%p1369_p5), 7, %s860_s17 }
  0x68   : > { %p296_p3 = scmp.lt.s32.totalorder (%p1369_p5), %s295_s19, 4  ;;  %s1492_s30 = scalar_lea.sflag (%p1369_p5), [#allocation6], %s289_s15 }
  0x69   : > { %s293_s13 = scalar_lea.vmem (%p1369_p5), [#allocation7], %s859_s16 }
  0x6a   : > { %s1809_s19 = smov (!%p296_p3, %s295_s19), 4 }
  0x6b   : > { %s861_s11 = sshll.u32 %s1809_s19, 3 }
  0x6c   : > { %s299_s14 = ssub.s32 32, %s861_s11 }
  0x6d   : > { %s300_s12 = sshll.u32 %s299_s14, 4 }
  0x6e   : > { %301 = vsyncadd %s1492_s30, %s300_s12  ;;  %p1495_p11 = scmp.ne.s32.totalorder %s861_s11, 0  ;;  %s902_s26 = sshll.u32 %s1275_s24, 5 }
  0x6f   : > { %s304_s18 = scalar_lea.hbm %s1767_s2, %s902_s26  ;;  %s1503_s20 = sshll.u32 %s293_s13, 4  ;;  %s309_s20 = int_to_ptr.vmem [resolvable:$true] %s1503_s20 }
  0x70   : > { %s306_s15 = sshll.u32 %s304_s18, 4  ;;  %s1777_s16 = sshll.u32 %s1809_s19, 7  ;;  %s1506_s15 = int_to_ptr.hbm [resolvable:$true] %s306_s15 }
  0x71   : > { %s1041_s17 = sshra.s32 %s1506_s15, 4  ;;  %s1043_s11 = sshrl.u32 %s1777_s16, 4  ;;  %s1042_s17 = int_to_ptr.hbm [resolvable:$true] %s1041_s17 }
  0x72   : > { %s1048_s14 = scalar_lea.hbm %s1042_s17, %s1043_s11  ;;  %s1052_s13 = scalar_lea.hbm %s1767_s2, 56 }
  0x73   : > { %p1049_p4 = scmp.ne.s32.totalorder %s1042_s17, %s1048_s14  ;;  %p1053_p12 = scmp.lt.s32.totalorder %s1042_s17, %s1767_s2 }
  0x74   : > { %p1054_p0 = scmp.lt.s32.totalorder %s1052_s13, %s1048_s14 }
  0x75   : > { %p1050_p7 = pnand %p1049_p4, %p1495_p11 }
  0x76   : > { %p1055_p1 = por %p1054_p0, %p1053_p12 }
  0x77   : > { %p1051_p8 = pneg %p1050_p7 }
  0x79   : > { %p1056_p10 = pnand %p1055_p1, %p1051_p8 }
  0x7b   : > { %1059 = shalt.err (!%p1056_p10)
}
  0x7c   : > { %s1060_s18 = sshra.s32 %s309_s20, 4  ;;  %s1283_s12 = smov [#allocation7]   ;;  %s1061_s18 = int_to_ptr.vmem [resolvable:$true] %s1060_s18 }
  0x7d   : > { %s1067_s16 = scalar_lea.vmem %s1061_s18, %s1043_s11  ;;  %s1071_s26 = scalar_lea.vmem %s1283_s12, 64 }
  0x7e   : > { %p1068_p13 = scmp.ne.s32.totalorder %s1061_s18, %s1067_s16  ;;  %p1073_p4 = scmp.lt.s32.totalorder %s1071_s26, %s1067_s16 }
  0x80   : > { %p1069_p2 = pnand %p1068_p13, %p1495_p11 }
  0x82   : > { %p1070_p3 = pneg %p1069_p2 }
  0x84   : > { %p1075_p7 = pnand %p1073_p4, %p1070_p3 }
  0x86   : > { %1078 = shalt.err (!%p1075_p7)
}
  0x87   : > { %s1284_s17 = smov 128   ;;  %s1285_s14 = smov 8  }
  0x88   : > { %s1791_s13 = sshll.u32 %s1809_s19, 7 }
  0x89   : > { %314 = dma.hbm_to_vmem [thread:$0]  (%p1495_p11), %s1506_s15, %s1791_s13, %s309_s20, %s1492_s30, %s1284_s17, %s1284_s17, %s1285_s14  }
  0x8a PF: > { %317 = sbr.rel (!%p1369_p5) target bundleno = 175 (0xaf), region = 32  ;;  %s318_s16 = sand.u32 (%p1369_p5), 1, %s1275_s24  }
  0x8b   : > { %s320_s11 = sand.u32 (%p1369_p5), 1, %s1271_s23   ;;  %s867_s28 = sshll.u32 (%p1369_p5), %s1275_s24, 2 }
  0x8c   : > { %s866_s29 = sshll.u32 (%p1369_p5), %s320_s11, 5  ;;  %s324_s18 = ssub.s32 (%p1369_p5), 7, %s867_s28 }
  0x8d   : > { %p325_p8 = scmp.lt.s32.totalorder (%p1369_p5), %s324_s18, 4  ;;  %s1540_s30 = scalar_lea.sflag (%p1369_p5), [#allocation9], %s318_s16 }
  0x8e   : > { %s322_s20 = scalar_lea.vmem (%p1369_p5), [#allocation8], %s866_s29 }
  0x8f   : > { %s1811_s18 = smov (!%p325_p8, %s324_s18), 4 }
  0x90   : > { %s868_s27 = sshll.u32 %s1811_s18, 3 }
  0x91   : > { %s328_s12 = ssub.s32 32, %s868_s27 }
  0x92   : > { %s329_s19 = sshll.u32 %s328_s12, 4 }
  0x93   : > { %330 = vsyncadd %s1540_s30, %s329_s19  ;;  %p1543_p11 = scmp.ne.s32.totalorder %s868_s27, 0  ;;  %s903_s26 = sshll.u32 %s1275_s24, 5 }
  0x94   : > { %s333_s13 = scalar_lea.hbm %s1768_s3, %s903_s26  ;;  %s1551_s11 = sshll.u32 %s322_s20, 4  ;;  %s338_s11 = int_to_ptr.vmem [resolvable:$true] %s1551_s11 }
  0x95   : > { %s335_s16 = sshll.u32 %s333_s13, 4  ;;  %s1778_s29 = sshll.u32 %s1811_s18, 7  ;;  %s1554_s16 = int_to_ptr.hbm [resolvable:$true] %s335_s16 }
  0x96   : > { %s1080_s28 = sshra.s32 %s1554_s16, 4  ;;  %s1082_s27 = sshrl.u32 %s1778_s29, 4  ;;  %s1081_s28 = int_to_ptr.hbm [resolvable:$true] %s1080_s28 }
  0x97   : > { %s1087_s12 = scalar_lea.hbm %s1081_s28, %s1082_s27  ;;  %s1091_s20 = scalar_lea.hbm %s1768_s3, 56 }
  0x98   : > { %p1088_p12 = scmp.ne.s32.totalorder %s1081_s28, %s1087_s12  ;;  %p1092_p10 = scmp.lt.s32.totalorder %s1081_s28, %s1768_s3 }
  0x99   : > { %p1093_p13 = scmp.lt.s32.totalorder %s1091_s20, %s1087_s12 }
  0x9a   : > { %p1089_p0 = pnand %p1088_p12, %p1543_p11 }
  0x9b   : > { %p1094_p2 = por %p1093_p13, %p1092_p10 }
  0x9c   : > { %p1090_p1 = pneg %p1089_p0 }
  0x9e   : > { %p1095_p3 = pnand %p1094_p2, %p1090_p1 }
  0xa0   : > { %1098 = shalt.err (!%p1095_p3)
}
  0xa1   : > { %s1099_s13 = sshra.s32 %s338_s11, 4  ;;  %s1286_s19 = smov [#allocation8]   ;;  %s1100_s13 = int_to_ptr.vmem [resolvable:$true] %s1099_s13 }
  0xa2   : > { %s1106_s29 = scalar_lea.vmem %s1100_s13, %s1082_s27  ;;  %s1110_s26 = scalar_lea.vmem %s1286_s19, 64 }
  0xa3   : > { %p1107_p4 = scmp.ne.s32.totalorder %s1100_s13, %s1106_s29  ;;  %p1112_p12 = scmp.lt.s32.totalorder %s1110_s26, %s1106_s29 }
  0xa5   : > { %p1108_p7 = pnand %p1107_p4, %p1543_p11 }
  0xa7   : > { %p1109_p8 = pneg %p1108_p7 }
  0xa9   : > { %p1114_p0 = pnand %p1112_p12, %p1109_p8 }
  0xab   : > { %1117 = shalt.err (!%p1114_p0)
}
  0xac   : > { %s1287_s28 = smov 128   ;;  %s1288_s12 = smov 8  }
  0xad   : > { %s1793_s20 = sshll.u32 %s1811_s18, 7 }
  0xae   : > { %343 = dma.hbm_to_vmem [thread:$0]  (%p1543_p11), %s1554_s16, %s1793_s20, %s338_s11, %s1540_s30, %s1287_s28, %s1287_s28, %s1288_s12  }
  0xaf PF: > { %346 = sbr.rel (!%p1369_p5) target bundleno = 212 (0xd4), region = 36  ;;  %s347_s29 = sand.u32 (%p1369_p5), 1, %s1275_s24  }
  0xb0   : > { %s349_s27 = sand.u32 (%p1369_p5), 1, %s1271_s23   ;;  %s874_s14 = sshll.u32 (%p1369_p5), %s1275_s24, 2 }
  0xb1   : > { %s873_s17 = sshll.u32 (%p1369_p5), %s349_s27, 5  ;;  %s353_s13 = ssub.s32 (%p1369_p5), 7, %s874_s14 }
  0xb2   : > { %p354_p1 = scmp.lt.s32.totalorder (%p1369_p5), %s353_s13, 4  ;;  %s1588_s30 = scalar_lea.sflag (%p1369_p5), [#allocation9], %s347_s29 }
  0xb3   : > { %s351_s11 = scalar_lea.vmem (%p1369_p5), [#allocation10], %s873_s17 }
  0xb4   : > { %s1813_s13 = smov (!%p354_p1, %s353_s13), 4 }
  0xb5   : > { %s875_s15 = sshll.u32 %s1813_s13, 3 }
  0xb6   : > { %s357_s19 = ssub.s32 32, %s875_s15 }
  0xb7   : > { %s358_s18 = sshll.u32 %s357_s19, 4 }
  0xb8   : > { %359 = vsyncadd %s1588_s30, %s358_s18  ;;  %p1591_p11 = scmp.ne.s32.totalorder %s875_s15, 0  ;;  %s904_s26 = sshll.u32 %s1275_s24, 5 }
  0xb9   : > { %s362_s20 = scalar_lea.hbm %s1769_s4, %s904_s26  ;;  %s1599_s27 = sshll.u32 %s351_s11, 4  ;;  %s367_s27 = int_to_ptr.vmem [resolvable:$true] %s1599_s27 }
  0xba   : > { %s364_s29 = sshll.u32 %s362_s20, 4  ;;  %s1779_s17 = sshll.u32 %s1813_s13, 7  ;;  %s1602_s29 = int_to_ptr.hbm [resolvable:$true] %s364_s29 }
  0xbb   : > { %s1119_s14 = sshra.s32 %s1602_s29, 4  ;;  %s1121_s15 = sshrl.u32 %s1779_s17, 4  ;;  %s1120_s14 = int_to_ptr.hbm [resolvable:$true] %s1119_s14 }
  0xbc   : > { %s1126_s19 = scalar_lea.hbm %s1120_s14, %s1121_s15  ;;  %s1130_s11 = scalar_lea.hbm %s1769_s4, 56 }
  0xbd   : > { %p1127_p10 = scmp.ne.s32.totalorder %s1120_s14, %s1126_s19  ;;  %p1131_p3 = scmp.lt.s32.totalorder %s1120_s14, %s1769_s4 }
  0xbe   : > { %p1132_p4 = scmp.lt.s32.totalorder %s1130_s11, %s1126_s19 }
  0xbf   : > { %p1128_p13 = pnand %p1127_p10, %p1591_p11 }
  0xc0   : > { %p1133_p7 = por %p1132_p4, %p1131_p3 }
  0xc1   : > { %p1129_p2 = pneg %p1128_p13 }
  0xc3   : > { %p1134_p8 = pnand %p1133_p7, %p1129_p2 }
  0xc5   : > { %1137 = shalt.err (!%p1134_p8)
}
  0xc6   : > { %s1138_s20 = sshra.s32 %s367_s27, 4  ;;  %s1289_s18 = smov [#allocation10]   ;;  %s1139_s20 = int_to_ptr.vmem [resolvable:$true] %s1138_s20 }
  0xc7   : > { %s1145_s17 = scalar_lea.vmem %s1139_s20, %s1121_s15  ;;  %s1149_s26 = scalar_lea.vmem %s1289_s18, 64 }
  0xc8   : > { %p1146_p12 = scmp.ne.s32.totalorder %s1139_s20, %s1145_s17  ;;  %p1151_p10 = scmp.lt.s32.totalorder %s1149_s26, %s1145_s17 }
  0xca   : > { %p1147_p0 = pnand %p1146_p12, %p1591_p11 }
  0xcc   : > { %p1148_p1 = pneg %p1147_p0 }
  0xce   : > { %p1153_p13 = pnand %p1151_p10, %p1148_p1 }
  0xd0   : > { %1156 = shalt.err (!%p1153_p13)
}
  0xd1   : > { %s1290_s14 = smov 128   ;;  %s1291_s19 = smov 8  }
  0xd2   : > { %s1795_s11 = sshll.u32 %s1813_s13, 7 }
  0xd3   : > { %372 = dma.hbm_to_vmem [thread:$0]  (%p1591_p11), %s1602_s29, %s1795_s11, %s367_s27, %s1588_s30, %s1290_s14, %s1290_s14, %s1291_s19  }
  0xd4 PF: > { %375 = sbr.rel (!%p1369_p5) target bundleno = 248 (0xf8), region = 40  ;;  %s376_s17 = sand.u32 (%p1369_p5), 1, %s1271_s23  }
  0xd5   : > { %s881_s15 = sshll.u32 (%p1369_p5), %s1275_s24, 2  ;;  %s880_s28 = sshll.u32 (%p1369_p5), %s376_s17, 5 }
  0xd6   : > { %s382_s12 = ssub.s32 (%p1369_p5), 7, %s881_s15  ;;  %s1635_s26 = scalar_lea.sflag (%p1369_p5), [#allocation12], %s376_s17 }
  0xd7   : > { %p383_p2 = scmp.lt.s32.totalorder (%p1369_p5), %s382_s12, 4  ;;  %s380_s13 = scalar_lea.vmem (%p1369_p5), [#allocation11], %s880_s28 }
  0xd9   : > { %s1815_s12 = smov (!%p383_p2, %s382_s12), 4 }
  0xda   : > { %s882_s20 = sshll.u32 %s1815_s12, 3 }
  0xdb   : > { %s386_s18 = ssub.s32 32, %s882_s20 }
  0xdc   : > { %s387_s16 = sshll.u32 %s386_s18, 4 }
  0xdd   : > { %388 = vsyncadd %s1635_s26, %s387_s16  ;;  %p1638_p5 = scmp.ne.s32.totalorder %s882_s20, 0  ;;  %s905_s30 = sshll.u32 %s1275_s24, 5 }
  0xde   : > { %s391_s14 = scalar_lea.hbm %s1770_s5, %s905_s30  ;;  %s1646_s19 = sshll.u32 %s380_s13, 4  ;;  %s396_s19 = int_to_ptr.vmem [resolvable:$true] %s1646_s19 }
  0xdf   : > { %s393_s11 = sshll.u32 %s391_s14, 4  ;;  %s886_s17 = sshll.u32 %s1815_s12, 7  ;;  %s1649_s11 = int_to_ptr.hbm [resolvable:$true] %s393_s11 }
  0xe0   : > { %s1158_s15 = sshra.s32 %s1649_s11, 4  ;;  %s1160_s28 = sshrl.u32 %s886_s17, 4  ;;  %s1159_s15 = int_to_ptr.hbm [resolvable:$true] %s1158_s15 }
  0xe1   : > { %s1165_s20 = scalar_lea.hbm %s1159_s15, %s1160_s28  ;;  %s1169_s13 = scalar_lea.hbm %s1770_s5, 56 }
  0xe2   : > { %p1166_p11 = scmp.ne.s32.totalorder %s1159_s15, %s1165_s20  ;;  %p1170_p7 = scmp.lt.s32.totalorder %s1159_s15, %s1770_s5 }
  0xe3   : > { %p1171_p8 = scmp.lt.s32.totalorder %s1169_s13, %s1165_s20 }
  0xe4   : > { %p1167_p3 = pnand %p1166_p11, %p1638_p5 }
  0xe5   : > { %p1172_p12 = por %p1171_p8, %p1170_p7 }
  0xe6   : > { %p1168_p4 = pneg %p1167_p3 }
  0xe8   : > { %p1173_p0 = pnand %p1172_p12, %p1168_p4 }
  0xea   : > { %1176 = shalt.err (!%p1173_p0)
}
  0xeb   : > { %s1177_s29 = sshra.s32 %s396_s19, 4  ;;  %s1292_s18 = smov [#allocation11]   ;;  %s1178_s29 = int_to_ptr.vmem [resolvable:$true] %s1177_s29 }
  0xec   : > { %s1184_s14 = scalar_lea.vmem %s1178_s29, %s1160_s28  ;;  %s1188_s16 = scalar_lea.vmem %s1292_s18, 64 }
  0xed   : > { %p1185_p1 = scmp.ne.s32.totalorder %s1178_s29, %s1184_s14  ;;  %p1190_p2 = scmp.lt.s32.totalorder %s1188_s16, %s1184_s14 }
  0xef   : > { %p1186_p10 = pnand %p1185_p1, %p1638_p5 }
  0xf1   : > { %p1187_p13 = pneg %p1186_p10 }
  0xf3   : > { %p1192_p11 = pnand %p1190_p2, %p1187_p13 }
  0xf5   : > { %1195 = shalt.err (!%p1192_p11)
}
  0xf6   : > { %s1293_s15 = smov 128   ;;  %s1294_s20 = smov 8  }
  0xf7   : > { %401 = dma.hbm_to_vmem [thread:$0]  (%p1638_p5), %s1649_s11, %s886_s17, %s396_s19, %s1635_s26, %s1293_s15, %s1293_s15, %s1294_s20  }
  0xf8 PF: > { %p887_p3 = scmp.ge.s32.totalorder %s1275_s24, 1  ;;  %p403_p4 = scmp.lt.s32.totalorder %s1275_s24, 3 }
  0xfa   : > { %p404_p7 = pnand %p887_p3, %p403_p4 }
  0xfb   : > { %s1678_s28 = sand.u32 (!%p404_p7), 1, %s1267_s22  }
  0xfc   : > { %407 = sbr.rel (%p404_p7) target bundleno = 297 (0x129), region = 44  ;;  %s888_s13 = sshll.u32 (!%p404_p7), %s1678_s28, 5 }
  0xfd   : > { %s410_s30 = scalar_lea.sflag (!%p404_p7), [#allocation3], %s1678_s28  ;;  %s413_s7 = scalar_lea.vmem (!%p404_p7), [#allocation2], %s888_s13 }
 0x101   : > { %1242 = dma.done.wait (%p1373_p6), %s410_s30, 512  }
 0x102   : > { %1244 = vsyncadd (%p1373_p6), %s410_s30, 4294966784  ;;  %s419_s12 = sand.u32 1, %s1351_s25   ;;  %s423_s19 = scalar_lea.vmem [#allocation5], %s888_s13 }
 0x103   : > { %s420_s26 = scalar_lea.sflag [#allocation6], %s419_s12 }
 0x104   : > { %1246 = dma.done.wait (%p1373_p6), %s420_s26, 1024  }
 0x105   : > { %1248 = vsyncadd (%p1373_p6), %s420_s26, 4294966272  ;;  %s433_s11 = scalar_lea.vmem [#allocation7], %s888_s13  ;;  %s440_s17 = scalar_lea.sflag [#allocation9], %s419_s12 }
 0x106   : > { %s1691_s27 = scalar_lea.vmem [#allocation8], %s888_s13 }
 0x107   : > { %1250 = dma.done.wait (%p1373_p6), %s440_s17, 1024  }
 0x108   : > { %1252 = vsyncadd (%p1373_p6), %s440_s17, 4294966272  ;;  %s1697_s29 = scalar_lea.vmem [#allocation10], %s888_s13  ;;  %s460_s14 = scalar_lea.sflag [#allocation12], %s1678_s28 }
 0x109   : > { %s1700_s18 = scalar_lea.vmem [#allocation11], %s888_s13 }
 0x10a   : > { %1254 = dma.done.wait (%p1373_p6), %s460_s14, 512  }
 0x10b   : > { %1256 = vsyncadd (%p1373_p6), %s460_s14, 4294966784  ;;  %v625_v0 = vlaneseq  ;;  %s895_s16 = sshll.u32 %s1351_s25, 5  ;;  %v548_v3 = vld [vmem:[%s413_s7] sm:$0xff]  ;;  %v549_v4 = vld [vmem:[%s413_s7 + $0x8] sm:$0xff]  ;;  %s894_s8 = sshll.u32 %s1678_s28, 3 }
 0x10c   : > { %v550_v5 = vld [vmem:[%s413_s7 + $0x10] sm:$0xff]  ;;  %v630_v8 = vstv %s895_s16  ;;  %v551_v9 = vld [vmem:[%s413_s7 + $0x18] sm:$0xff]  ;;  %v552_v10 = vld [vmem:[%s423_s19] sm:$0xff]  ;;  %s897_s15 = sshll.u32 %s1351_s25, 3  ;;  %s517_s25 = scalar_lea.vmem [#allocation13], %s894_s8 }
 0x10d   : > { %v626_v1 = vshrl.u32 %v625_v0, 7  ;;  %v553_v11 = vld [vmem:[%s423_s19 + $0x8] sm:$0xff]  ;;  %v554_v12 = vld [vmem:[%s423_s19 + $0x10] sm:$0xff]  ;;  %v555_v13 = vld [vmem:[%s423_s19 + $0x18] sm:$0xff]  ;;  %v572_v15 = vsub.f32 %v548_v3, %v552_v10  ;;  %s658_s30 = scalar_lea.hbm %s1771_s6, %s897_s15  ;;  %s660_s7 = sshll.u32 %s517_s25, 4  ;;  %s661_s7 = int_to_ptr.vmem [resolvable:$true] %s660_s7 }
 0x10e   : > { %v556_v14 = vld [vmem:[%s433_s11] sm:$0xff]  ;;  %v573_v16 = vsub.f32 %v549_v4, %v553_v11  ;;  %v557_v17 = vld [vmem:[%s433_s11 + $0x8] sm:$0xff]  ;;  %v558_v18 = vld [vmem:[%s433_s11 + $0x10] sm:$0xff]  ;;  %v574_v20 = vsub.f32 %v550_v5, %v554_v12  ;;  %v575_v21 = vsub.f32 %v551_v9, %v555_v13  ;;  %s662_s12 = sshll.u32 %s658_s30, 4  ;;  %s648_s26 = scalar_lea.sflag [#allocation4], %s1678_s28  ;;  %s663_s12 = int_to_ptr.hbm [resolvable:$true] %s662_s12 }
 0x10f   : > { %v627_v2 = vadd.s32 8, %v626_v1  ;;  %v628_v6 = vadd.s32 16, %v626_v1  ;;  %v629_v7 = vadd.s32 24, %v626_v1  ;;  %v559_v19 = vld [vmem:[%s433_s11 + $0x18] sm:$0xff]  ;;  %v1707_v22 = vadd.s32 %v630_v8, %v626_v1  ;;  %v560_v24 = vld [vmem:[%s1691_s27] sm:$0xff]  ;;  %v561_v25 = vld [vmem:[%s1691_s27 + $0x8] sm:$0xff] }
 0x110   : > { %v562_v26 = vld [vmem:[%s1691_s27 + $0x10] sm:$0xff]  ;;  %v576_v27 = vsub.f32 %v572_v15, %v556_v14  ;;  %v577_v28 = vsub.f32 %v573_v16, %v557_v17  ;;  %v563_v31 = vld [vmem:[%s1691_s27 + $0x18] sm:$0xff]  ;;  %v564_v32 = vld [vmem:[%s1697_s29] sm:$0xff]  ;;  %v578_v34 = vsub.f32 %v574_v20, %v558_v18  ;;  %v579_v35 = vsub.f32 %v575_v21, %v559_v19  ;;  %s1211_s19 = sshra.s32 %s663_s12, 4  ;;  %s1212_s19 = int_to_ptr.hbm [resolvable:$true] %s1211_s19 }
 0x111   : > { %v1709_v23 = vadd.s32 %v630_v8, %v627_v2  ;;  %v1714_v29 = vadd.s32 %v630_v8, %v628_v6  ;;  %v1716_v30 = vadd.s32 %v630_v8, %v629_v7  ;;  %v565_v33 = vld [vmem:[%s1697_s29 + $0x8] sm:$0xff]  ;;  %v580_v36 = vsub.f32 %v556_v14, %v560_v24  ;;  %v566_v38 = vld [vmem:[%s1697_s29 + $0x10] sm:$0xff]  ;;  %v567_v39 = vld [vmem:[%s1697_s29 + $0x18] sm:$0xff]  ;;  %s1213_s11 = scalar_lea.hbm %s1212_s19, 8  ;;  %s1217_s29 = scalar_lea.hbm %s1771_s6, 16 }
 0x112   : > { %v581_v37 = vsub.f32 %v557_v17, %v561_v25  ;;  %v568_v40 = vld [vmem:[%s1700_s18] sm:$0xff]  ;;  %v582_v41 = vsub.f32 %v558_v18, %v562_v26  ;;  %v583_v42 = vsub.f32 %v559_v19, %v563_v31  ;;  %v588_v43 = vsub.f32 %v552_v10, %v564_v32  ;;  %v569_v45 = vld [vmem:[%s1700_s18 + $0x8] sm:$0xff]  ;;  %v570_v46 = vld [vmem:[%s1700_s18 + $0x10] sm:$0xff]  ;;  %p1214_p6 = scmp.ne.s32.totalorder %s1212_s19, %s1213_s11  ;;  %p1218_p12 = scmp.lt.s32.totalorder %s1212_s19, %s1771_s6 }
 0x113   : > { %v589_v44 = vsub.f32 %v553_v11, %v565_v33  ;;  %v571_v47 = vld [vmem:[%s1700_s18 + $0x18] sm:$0xff]  ;;  %v584_v48 = vsub.f32 %v580_v36, %v548_v3  ;;  %v590_v50 = vsub.f32 %v554_v12, %v566_v38  ;;  %v591_v51 = vsub.f32 %v555_v13, %v567_v39  ;;  %p1219_p0 = scmp.lt.s32.totalorder %s1217_s29, %s1213_s11 }
 0x114   : > { %v585_v49 = vsub.f32 %v581_v37, %v549_v4  ;;  %v586_v52 = vsub.f32 %v582_v41, %v550_v5  ;;  %v587_v53 = vsub.f32 %v583_v42, %v551_v9  ;;  %v592_v54 = vsub.f32 %v560_v24, %v568_v40  ;;  %p1215_p5 = pnand %p1214_p6, %p1378_p9 }
 0x115   : > { %v593_v55 = vsub.f32 %v561_v25, %v569_v45  ;;  %v594_v56 = vsub.f32 %v562_v26, %v570_v46  ;;  %v595_v57 = vsub.f32 %v563_v31, %v571_v47  ;;  %v596_v58 = vmul.f32 %v576_v27, %v576_v27  ;;  %p1220_p1 = por %p1219_p0, %p1218_p12 }
 0x116   : > { %v597_v59 = vmul.f32 %v577_v28, %v577_v28  ;;  %v598_v60 = vmul.f32 %v578_v34, %v578_v34  ;;  %v599_v61 = vmul.f32 %v579_v35, %v579_v35  ;;  %v600_v62 = vmul.f32 %v584_v48, %v584_v48  ;;  %p1216_p8 = pneg %p1215_p5 }
 0x117   : > { %v601_v63 = vmul.f32 %v585_v49, %v585_v49  ;;  %v602_v0 = vmul.f32 %v586_v52, %v586_v52  ;;  %v603_v1 = vmul.f32 %v587_v53, %v587_v53  ;;  %v608_v2 = vmul.f32 %v588_v43, %v588_v43 }
 0x118   : > { %v609_v3 = vmul.f32 %v589_v44, %v589_v44  ;;  %v604_v4 = vadd.f32 %v600_v62, %v596_v58  ;;  %v610_v5 = vmul.f32 %v590_v50, %v590_v50  ;;  %v611_v7 = vmul.f32 %v591_v51, %v591_v51  ;;  %p1221_p10 = pnand %p1220_p1, %p1216_p8 }
 0x119   : > { %v605_v6 = vadd.f32 %v601_v63, %v597_v59  ;;  %v606_v8 = vadd.f32 %v602_v0, %v598_v60  ;;  %v607_v9 = vadd.f32 %v603_v1, %v599_v61  ;;  %v616_v10 = vmul.f32 %v592_v54, %v592_v54 }
 0x11a   : > { %v617_v11 = vmul.f32 %v593_v55, %v593_v55  ;;  %v612_v12 = vadd.f32 %v608_v2, %v604_v4  ;;  %v618_v14 = vmul.f32 %v594_v56, %v594_v56  ;;  %v619_v15 = vmul.f32 %v595_v57, %v595_v57 }
 0x11b   : > { %v613_v13 = vadd.f32 %v609_v3, %v605_v6  ;;  %v614_v16 = vadd.f32 %v610_v5, %v606_v8  ;;  %v615_v17 = vadd.f32 %v611_v7, %v607_v9  ;;  %vm635_vm0 = vcmp.lt.s32.totalorder %v1707_v22, 51 }
 0x11c   : > { %vm636_vm1 = vcmp.lt.s32.totalorder %v1709_v23, 51  ;;  %v620_v18 = vadd.f32 %v616_v10, %v612_v12  ;;  %vm637_vm2 = vcmp.lt.s32.totalorder %v1714_v29, 51  ;;  %vm638_vm3 = vcmp.lt.s32.totalorder %v1716_v30, 51 }
 0x11d   : > { %v621_v19 = vadd.f32 %v617_v11, %v613_v13  ;;  %v622_v20 = vadd.f32 %v618_v14, %v614_v16  ;;  %v623_v21 = vadd.f32 %v619_v15, %v615_v17 }
 0x11e   : > { %v639_v24 = vsel %vm635_vm0, %v620_v18, 0.0 }
 0x11f   : > { %v640_v25 = vsel %vm636_vm1, %v621_v19, 0.0  ;;  %v641_v26 = vsel %vm637_vm2, %v622_v20, 0.0  ;;  %v642_v27 = vsel %vm638_vm3, %v623_v21, 0.0 }
 0x120   : > { %v643_v22 = vadd.f32 %v640_v25, %v639_v24 }
 0x122   : > { %v644_v23 = vadd.f32 %v643_v22, %v641_v26 }
 0x124   : > { %v645_v28 = vadd.f32 %v644_v23, %v642_v27 }
 0x126   : > { %646 = vst [vmem:[%s517_s25] sm:$0xff] %v645_v28 }
 0x127   : > { %1224 = shalt.err (!%p1221_p10)
}
 0x128   : > { %912 = dma.vmem_to_hbm [thread:$0]  (%p1378_p9), %s661_s7, 128, %s663_s12, %s648_s26  }
 0x129 PF: > { %s674_s28 = sand.u32 1, %s1263_s21   ;;  %p1797_p13 = scmp.ne.s32.totalorder %s1785_s10, 0 }
 0x12a   : > { %p1798_p2 = scmp.ge.s32.totalorder %s1275_s24, 2  ;;  %s675_s16 = scalar_lea.sflag [#allocation4], %s674_s28 }
 0x12c   : > { %p915_p11 = pnand %p1798_p2, %p1797_p13 }
 0x12e   : > { %p916_p3 = pneg %p915_p11 }
 0x130   : > { %1258 = dma.done.wait (%p916_p3), %s675_s16, 128  }
 0x131   : > { %1260 = vsyncadd (%p916_p3), %s675_s16, 4294967168  ;;  %s1799_s24 = sld [smem:[#allocation19_spill]]  ;;  %s1801_s21 = smov %s1267_s22 }
 0x132   : > { %s1800_s8 = sld [smem:[#allocation20_spill]]  ;;  %s1802_s22 = smov %s1271_s23 }
 0x137   : > { %p28_p4 = scmp.ge.s32.totalorder %s1799_s24, 4  }
 0x138   : > { %s1803_s23 = smov %s1800_s8 }
 0x139   :  { %30 = sbr.rel (!%p28_p4) target bundleno = 11 (0xb), region = 150 }
 0x13e   :  { %681 = vsyncpa [#allocation3], 1 }
 0x13f   :  { %683 = vsyncpa [#allocation3 + $0x1], 1 }
 0x140   :  { %684 = vsyncpa [#allocation6], 1 }
 0x141   :  { %686 = vsyncpa [#allocation6 + $0x1], 1 }
 0x142   :  { %687 = vsyncpa [#allocation9], 1 }
 0x143   :  { %689 = vsyncpa [#allocation9 + $0x1], 1 }
 0x144   :  { %690 = vsyncpa [#allocation12], 1 }
 0x145   :  { %692 = vsyncpa [#allocation12 + $0x1], 1 }
 0x146   :  { %693 = vsyncpa [#allocation4], 1 }
 0x147   :  { %695 = vsyncpa [#allocation4 + $0x1], 1 }

</bundles_post_ra>
